<compile_context>
chip_gen: v5e
topology: v5e:2x2
jax: 0.10.0
libtpu: 0.0.40
codegen_flags: <defaults>
</compile_context>

<pallas_src>
import functools

import jax
import jax.numpy as jnp
from jax.experimental import pallas as pl
from jax.experimental.pallas import tpu as pltpu


# ---------------------------------------------------------------------------
# One-off (per-sequence) kernel: encoder-side attention projection (hoisted,
# step-invariant).  Gridded over rows so it pipelines HBM<->VMEM when B*S is
# large; at the demo size it is a single block.
# ---------------------------------------------------------------------------
def _enc_proj_kernel(enc2d_ref, wa_e_ref, out_ref):
    out_ref[...] = jnp.dot(enc2d_ref[...].astype(jnp.bfloat16), wa_e_ref[...],
                           preferred_element_type=jnp.float32)


def precompute_encoder(enc_output, wa_enc_T):
    """enc_output: (S, B, He) -> (enc_bsh (B,S,He) f32, e_proj (B,S,Hd) f32)."""
    S, B, He = enc_output.shape
    Hd = wa_enc_T.shape[1]
    enc_bsh = jnp.transpose(enc_output, (1, 0, 2))        # (B, S, He)
    M = B * S
    enc2d = enc_bsh.reshape(M, He)
    tm = M if M <= 512 else 512                            # row tile
    eproj2d = pl.pallas_call(
        _enc_proj_kernel,
        out_shape=jax.ShapeDtypeStruct((M, Hd), jnp.float32),
        grid=(pl.cdiv(M, tm),),
        in_specs=[pl.BlockSpec((tm, He), lambda i: (i, 0)),
                  pl.BlockSpec((He, Hd), lambda i: (0, 0))],
        out_specs=pl.BlockSpec((tm, Hd), lambda i: (i, 0)),
        compiler_params=pltpu.CompilerParams(dimension_semantics=("parallel",)),
    )(enc2d, wa_enc_T)
    return enc_bsh, eproj2d.reshape(B, S, Hd)


# ---------------------------------------------------------------------------
# Fused multi-step decoder kernel: grid=(T,), one grid step == one module
# forward() call.  Weights / e_proj / enc_bsh resident; state carried in VMEM.
# ---------------------------------------------------------------------------
def _decoder_fused_kernel(e_proj_ref, enc_ref, dec_ref, s0_ref,
                          wa_s_ref, ba_ref, v_ref,
                          w0_ref, b0_ref, w1_ref, b1_ref,
                          wout_ref, bout_ref,
                          pre_ref, s_out_ref,
                          s_scr):
    t = pl.program_id(0)

    @pl.when(t == 0)
    def _():
        s_scr[...] = s0_ref[...]            # load the initial hidden state once

    e_proj = e_proj_ref[...]                # (B, S, Hd) = enc @ Wa_enc^T (precomputed)
    enc = enc_ref[...]                      # (B, S, He)
    dec_in = dec_ref[0]                     # (B, Fin)  this step's decoder input
    s0 = s_scr[0]                           # (B, Hd) layer-0 hidden
    s1 = s_scr[1]                           # (B, Hd) layer-1 (top) hidden
    B, S, Hd = e_proj.shape

    # ---- additive attention: energy = tanh(We*enc + Ws*s + b); score = v.energy
    s_part = (jnp.dot(s1.astype(jnp.bfloat16), wa_s_ref[...],
                      preferred_element_type=jnp.float32)
              + ba_ref[...])                                          # (B, Hd) f32
    energy = jnp.tanh(e_proj + s_part[:, None, :])                    # (B, S, Hd) f32
    scores = jnp.sum(energy * v_ref[...].reshape(1, 1, Hd), axis=-1)  # (B, S)
    scores = scores - jnp.max(scores, axis=-1, keepdims=True)
    ew = jnp.exp(scores)
    attn = ew / jnp.sum(ew, axis=-1, keepdims=True)                   # exact softmax

    # ---- context: VPU multiply + sublane reduce over S (no M=1 MXU bmm)
    context = jnp.sum(attn[:, :, None] * enc, axis=1)                 # (B, He) f32

    # ---- LSTM layer 0.  fc is folded into the input projection (exact: no
    #      nonlinearity between fc and the gate matmul).  Forget gate pruned
    #      because the reference zeroes c0 every forward -> c_prev == 0.
    x0 = jnp.concatenate([context, dec_in, s0], axis=-1).astype(jnp.bfloat16)
    g0 = (jnp.dot(x0, w0_ref[...], preferred_element_type=jnp.float32)
          + b0_ref[...])                                              # (B, 3*Hd) f32
    i0 = jax.nn.sigmoid(g0[:, 0 * Hd:1 * Hd])
    c0 = i0 * jnp.tanh(g0[:, 1 * Hd:2 * Hd])
    h0 = jax.nn.sigmoid(g0[:, 2 * Hd:3 * Hd]) * jnp.tanh(c0)

    # ---- LSTM layer 1 (nn.LSTM dropout only applies in training -> no-op).
    x1 = jnp.concatenate([h0, s1], axis=-1).astype(jnp.bfloat16)
    g1 = (jnp.dot(x1, w1_ref[...], preferred_element_type=jnp.float32)
          + b1_ref[...])
    i1 = jax.nn.sigmoid(g1[:, 0 * Hd:1 * Hd])
    c1 = i1 * jnp.tanh(g1[:, 1 * Hd:2 * Hd])
    h1 = jax.nn.sigmoid(g1[:, 2 * Hd:3 * Hd]) * jnp.tanh(c1)

    s_scr[0] = h0
    s_scr[1] = h1

    # ---- pre = softmax(linear(h1)).  Padded lanes carry a -1e30 f32 bias so
    #      they get exactly zero probability; the store is lane-dense (x128).
    logits = (jnp.dot(h1.astype(jnp.bfloat16), wout_ref[...],
                      preferred_element_type=jnp.float32)
              + bout_ref[...])                                        # (B, out_pad)
    logits = logits - jnp.max(logits, axis=-1, keepdims=True)
    el = jnp.exp(logits)
    pre_ref[0] = el / jnp.sum(el, axis=-1, keepdims=True)             # exact softmax

    @pl.when(t == pl.num_programs(0) - 1)
    def _():
        s_out_ref[...] = s_scr[...]


def prepare_params(params, enc_hid):
    """One-time weight prep, kept OUTSIDE the jitted decode call:
    prune the dead forget gate, fold fc into the LSTM-0 input projection,
    concatenate per-cell [W_ih; W_hh], merge biases, lane-pad the output
    projection to x128, and store all matmul weights in bf16."""
    out_size, dec_hid = params["w_out"].shape
    out_pad = ((out_size + 127) // 128) * 128

    def prune_gates_T(w):          # PyTorch order [i, f, g, o] -> keep [i, g, o]
        wi, _, wg, wo = jnp.split(w, 4, axis=0)
        return jnp.concatenate([wi, wg, wo], axis=0).T     # (in, 3*Hd)

    def prune_bias(b_ih, b_hh):
        b = b_ih + b_hh
        bi, _, bg, bo = jnp.split(b, 4)
        return jnp.concatenate([bi, bg, bo])                # (3*Hd,)

    wih0_T = prune_gates_T(params["w_ih0"])                 # (Fin, 3Hd)
    whh0_T = prune_gates_T(params["w_hh0"])                 # (Hd, 3Hd)
    b0 = prune_bias(params["b_ih0"], params["b_hh0"])

    # Fold fc: x = ctx@Wc + dec@Wd + b_fc feeds LSTM-0 linearly -> compose.
    wfc_c_T = params["w_fc"][:, :enc_hid].T                 # (He, Fin)
    wfc_d_T = params["w_fc"][:, enc_hid:].T                 # (Fin, Fin)
    w0_all = jnp.concatenate([wfc_c_T @ wih0_T,             # (He, 3Hd)
                              wfc_d_T @ wih0_T,             # (Fin, 3Hd)
                              whh0_T], axis=0)              # (He+Fin+Hd, 3Hd)
    b0_eff = params["b_fc"] @ wih0_T + b0                   # (3Hd,)

    wih1_T = prune_gates_T(params["w_ih1"])
    whh1_T = prune_gates_T(params["w_hh1"])
    w1_all = jnp.concatenate([wih1_T, whh1_T], axis=0)      # (2Hd, 3Hd)
    b1_eff = prune_bias(params["b_ih1"], params["b_hh1"])

    w_out_p = jnp.zeros((dec_hid, out_pad), jnp.float32)
    w_out_p = w_out_p.at[:, :out_size].set(params["w_out"].T)
    b_out_p = jnp.full((1, out_pad), -1e30, jnp.float32)    # stays f32
    b_out_p = b_out_p.at[0, :out_size].set(params["b_out"])

    bf16 = lambda x: x.astype(jnp.bfloat16)
    return {
        "wa_enc_T": bf16(params["wa_enc"].T),    # (He, Hd)
        "wa_s_T": bf16(params["wa_s"].T),        # (Hd, Hd)
        "ba": params["ba"][None, :],             # (1, Hd)   f32
        "v": params["v"][None, :],               # (1, Hd)   f32
        "w0": bf16(w0_all), "b0": b0_eff[None, :],
        "w1": bf16(w1_all), "b1": b1_eff[None, :],
        "wout": bf16(w_out_p), "bout": b_out_p,
    }


def decode_steps(e_proj, enc_bsh, dec_inputs, s, prepped, *, out_size):
    """T fused decode steps (one pallas_call).  Each grid step reproduces one
    forward() of the PyTorch module (attention with current s, c0 zeroed).
    dec_inputs: (T, B, Fin); s: (2, B, Hd).
    Returns (pre (T, B, out_size), s_final (2, B, Hd))."""
    T, B, Fin = dec_inputs.shape
    _, S, Hd = e_proj.shape
    He = enc_bsh.shape[2]
    out_pad = prepped["wout"].shape[1]

    const3 = lambda shape: pl.BlockSpec(shape, lambda t: (0, 0, 0))
    const2 = lambda shape: pl.BlockSpec(shape, lambda t: (0, 0))

    grid_spec = pltpu.PrefetchScalarGridSpec(
        num_scalar_prefetch=0,
        grid=(T,),
        in_specs=[
            const3((B, S, Hd)),                              # e_proj   (resident)
            const3((B, S, He)),                              # enc_bsh  (resident)
            pl.BlockSpec((1, B, Fin), lambda t: (t, 0, 0)),  # per-step dec input
            const3((2, B, Hd)),                              # initial state
            const2(prepped["wa_s_T"].shape),
            const2(prepped["ba"].shape),
            const2(prepped["v"].shape),
            const2(prepped["w0"].shape),
            const2(prepped["b0"].shape),
            const2(prepped["w1"].shape),
            const2(prepped["b1"].shape),
            const2(prepped["wout"].shape),
            const2(prepped["bout"].shape),
        ],
        out_specs=(
            pl.BlockSpec((1, B, out_pad), lambda t: (t, 0, 0)),  # per-step pre row
            const3((2, B, Hd)),                                  # final state
        ),
        scratch_shapes=[pltpu.VMEM((2, B, Hd), jnp.float32)],    # carried state
    )

    pre_pad, s_final = pl.pallas_call(
        _decoder_fused_kernel,
        out_shape=(jax.ShapeDtypeStruct((T, B, out_pad), jnp.float32),
                   jax.ShapeDtypeStruct((2, B, Hd), jnp.float32)),
        grid_spec=grid_spec,
        compiler_params=pltpu.CompilerParams(
            dimension_semantics=("arbitrary",)),   # sequential recurrence over T
    )(e_proj, enc_bsh, dec_inputs, s,
      prepped["wa_s_T"], prepped["ba"], prepped["v"],
      prepped["w0"], prepped["b0"], prepped["w1"], prepped["b1"],
      prepped["wout"], prepped["bout"])

    # Slice the lane padding exactly once, after all fused steps.
    return pre_pad[:, :, :out_size], s_final


def _init_params(key, in_features, output_size, enc_hid, dec_hid):
    ks = jax.random.split(key, 16)
    u = lambda k, shape, fan: jax.random.uniform(
        k, shape, jnp.float32, -1.0 / jnp.sqrt(fan), 1.0 / jnp.sqrt(fan))
    return {
        # additive attention: energy = tanh(W [enc ; s] + b); score = v . energy
        "wa_enc": u(ks[0], (dec_hid, enc_hid), enc_hid + dec_hid),
        "wa_s":   u(ks[1], (dec_hid, dec_hid), enc_hid + dec_hid),
        "ba":     u(ks[2], (dec_hid,), enc_hid + dec_hid),
        "v":      u(ks[3], (dec_hid,), dec_hid),
        # fc: Linear(in_features + enc_hid, in_features), input = [ret ; dec_input]
        "w_fc":   u(ks[4], (in_features, in_features + enc_hid), in_features + enc_hid),
        "b_fc":   u(ks[5], (in_features,), in_features + enc_hid),
        # LSTM layer 0
        "w_ih0":  u(ks[6], (4 * dec_hid, in_features), dec_hid),
        "w_hh0":  u(ks[7], (4 * dec_hid, dec_hid), dec_hid),
        "b_ih0":  u(ks[8], (4 * dec_hid,), dec_hid),
        "b_hh0":  u(ks[9], (4 * dec_hid,), dec_hid),
        # LSTM layer 1
        "w_ih1":  u(ks[10], (4 * dec_hid, dec_hid), dec_hid),
        "w_hh1":  u(ks[11], (4 * dec_hid, dec_hid), dec_hid),
        "b_ih1":  u(ks[12], (4 * dec_hid,), dec_hid),
        "b_hh1":  u(ks[13], (4 * dec_hid,), dec_hid),
        # output linear
        "w_out":  u(ks[14], (output_size, dec_hid), dec_hid),
        "b_out":  u(ks[15], (output_size,), dec_hid),
    }


if __name__ == "__main__":
    # Shapes consistent with the module (enc_hid == dec_hid so c0/s match the
    # LSTM hidden size).  B = 8 so every (B, X) tile is sublane-dense.
    S, B, T = 8, 8, 4
    in_features = 16
    enc_hid = dec_hid = 32
    output_size = 16

    key = jax.random.PRNGKey(0)
    k_enc, k_dec, k_s, k_par = jax.random.split(key, 4)

    enc_output = jax.random.normal(k_enc, (S, B, enc_hid), jnp.float32)
    dec_inputs = jax.random.normal(k_dec, (T, B, in_features), jnp.float32)
    s = jax.random.normal(k_s, (2, B, dec_hid), jnp.float32)
    params = _init_params(k_par, in_features, output_size, enc_hid, dec_hid)

    # One-time weight prep + step-invariant encoder projection (hoisted out of
    # the decode loop entirely).
    prepped = prepare_params(params, enc_hid)
    enc_bsh, e_proj = jax.jit(precompute_encoder)(enc_output, prepped["wa_enc_T"])

    decode_fn = jax.jit(functools.partial(decode_steps, out_size=output_size))

    # (a) single step == exactly one forward() of the PyTorch module.
    pre1, s1_new = decode_fn(e_proj, enc_bsh, dec_inputs[:1], s, prepped)
    # (b) T fused decode steps in ONE pallas_call (weights/keys stay resident).
    preT, sT_new = decode_fn(e_proj, enc_bsh, dec_inputs, s, prepped)
    jax.block_until_ready((pre1, s1_new, preT, sT_new))

    assert pre1.shape == (1, B, output_size) and s1_new.shape == (2, B, dec_hid)
    assert preT.shape == (T, B, output_size) and sT_new.shape == (2, B, dec_hid)
    assert bool(jnp.all(jnp.isfinite(preT))) and bool(jnp.all(jnp.isfinite(sT_new)))
    # exact softmax normalization -> rows sum to 1
    assert bool(jnp.allclose(jnp.sum(pre1, axis=-1), 1.0, atol=1e-3))
    assert bool(jnp.allclose(jnp.sum(preT, axis=-1), 1.0, atol=1e-3))
    # fused step 0 must match the standalone single step
    assert bool(jnp.allclose(pre1[0], preT[0], atol=1e-5))
    print("KERNEL_OK")
</pallas_src>

<mosaic_0001>
module attributes {stable_mosaic.version = 11 : i64} {
  func.func @_enc_proj_kernel(%arg0: i32, %arg1: memref<64x32xf32, #tpu.memory_space<vmem>>, %arg2: memref<32x32xbf16, #tpu.memory_space<vmem>>, %arg3: memref<64x32xf32, #tpu.memory_space<vmem>>) attributes {dimension_semantics = [#tpu.dimension_semantics<parallel>], iteration_bounds = array<i64: 1>, scalar_prefetch = 0 : i64, scratch_operands = 0 : i64, tpu.core_type = #tpu.core_type<tc>, window_params = [{transform_indices = @transform_0, window_bounds = array<i64: 64, 32>}, {pipeline_mode = #tpu.pipeline_mode<synchronous>, transform_indices = @transform_1, window_bounds = array<i64: 32, 32>}, {transform_indices = @transform_2, window_bounds = array<i64: 64, 32>}]} {
    %c0 = arith.constant 0 : index
    %c0_0 = arith.constant 0 : index
    %0 = vector.load %arg1[%c0, %c0_0] : memref<64x32xf32, #tpu.memory_space<vmem>>, vector<64x32xf32>
    %1 = arith.truncf %0 : vector<64x32xf32> to vector<64x32xbf16>
    %c0_1 = arith.constant 0 : index
    %c0_2 = arith.constant 0 : index
    %2 = vector.load %arg2[%c0_1, %c0_2] : memref<32x32xbf16, #tpu.memory_space<vmem>>, vector<32x32xbf16>
    %cst = arith.constant dense<0.000000e+00> : vector<64x32xf32>
    %3 = tpu.matmul %1, %2, %cst {dimension_numbers = #tpu.dot_dimension_numbers<[1], [0], [0], [1], [0, 0, 1, 1], [], []>} : vector<64x32xbf16>, vector<32x32xbf16>, vector<64x32xf32> -> vector<64x32xf32>
    %c0_3 = arith.constant 0 : index
    %c0_4 = arith.constant 0 : index
    %4 = vector.load %arg3[%c0_3, %c0_4] : memref<64x32xf32, #tpu.memory_space<vmem>>, vector<64x32xf32>
    tpu.vector_store %arg3[%c0_3, %c0_4], %3 {strides = array<i32>} : memref<64x32xf32, #tpu.memory_space<vmem>>, vector<64x32xf32>,
    return
  }
  func.func @transform_0(%arg0: i32) -> (i32, i32) {
    %c0_i32 = arith.constant 0 : i32
    %c0_i32_0 = arith.constant 0 : i32
    return %arg0, %c0_i32 : i32, i32
  }
  func.func @transform_1(%arg0: i32) -> (i32, i32) {
    %c0_i32 = arith.constant 0 : i32
    %c0_i32_0 = arith.constant 0 : i32
    %c0_i32_1 = arith.constant 0 : i32
    return %c0_i32, %c0_i32_0 : i32, i32
  }
  func.func @transform_2(%arg0: i32) -> (i32, i32) {
    %c0_i32 = arith.constant 0 : i32
    %c0_i32_0 = arith.constant 0 : i32
    return %arg0, %c0_i32 : i32, i32
  }
}

</mosaic_0001>

<bundles_post_ra>
// kernel: precompute_encoder.1
= control target key start
LH: loop header
LB: loop body
LE: loop exit
PB: predicated region body
PF: predicated region fallthrough
CT: control target
= control target key end

     0   :  { %s221_s0 = inlined_call_operand.vmem [shape: f32[64,32], index: 0, kind: input, shape index: {}]   ;;  %s222_s1 = inlined_call_operand.vmem [shape: bf16[32,32], index: 1, kind: input, shape index: {}]   ;;  %s223_s2 = inlined_call_operand.hbm [shape: f32[64,32], index: 2, kind: output, shape index: {}]  }
   0x1   :  { %v122_v0 = vld [vmem:[%s222_s1 + $0x8] sm:$0xff]  ;;  %v121_v1 = vld [vmem:[%s222_s1] sm:$0xff]  ;;  %v15_v4 = vld [vmem:[%s221_s0 + $0x10] sm:$0xff] }
   0x2   :  { %v13_v2 = vld [vmem:[%s221_s0] sm:$0xff]  ;;  %v14_v3 = vld [vmem:[%s221_s0 + $0x8] sm:$0xff]  ;;  %60 = vmatpush.bf16.msra.mxu0 %v122_v0  ;;  %123 = vmatpush.bf16.msra.mxu1 %v122_v0  ;;  %v16_v5 = vld [vmem:[%s221_s0 + $0x18] sm:$0xff] }
   0x3   :  { %v17_v6 = vld [vmem:[%s221_s0 + $0x20] sm:$0xff]  ;;  %v18_v7 = vld [vmem:[%s221_s0 + $0x28] sm:$0xff]  ;;  %124 = vmatpush.bf16.msra.mxu2 %v122_v0  ;;  %125 = vmatpush.bf16.msra.mxu3 %v122_v0  ;;  %v19_v8 = vld [vmem:[%s221_s0 + $0x30] sm:$0xff] }
   0x4   :  { %v20_v9 = vld [vmem:[%s221_s0 + $0x38] sm:$0xff] }
   0x5   :  { %7 = vsyncpa [#allocation3], 0  ;;  %v21_v10 = vpack.c.bf16 %v14_v3, %v13_v2  ;;  %v22_v11 = vpack.c.bf16 %v16_v5, %v15_v4  ;;  %vm41_vm0 = vcmask 261120   ;;  %v23_v12 = vpack.c.bf16 %v18_v7, %v17_v6  ;;  %s158_s0 = smov [#allocation2]   ;;  %s97_s3 = sshll.u32 %s223_s2, 4  ;;  %s98_s3 = int_to_ptr.hbm [resolvable:$true] %s97_s3 }
   0x6   :  { %61 = vmatpush.bf16.msra.mxu0 %v121_v1  ;;  %126 = vmatpush.bf16.msra.mxu1 %v121_v1  ;;  %v24_v13 = vpack.c.bf16 %v20_v9, %v19_v8  ;;  %s95_s28 = sshll.u32 %s158_s0, 4  ;;  %s159_s4 = smov 128   ;;  %s96_s28 = int_to_ptr.vmem [resolvable:$true] %s95_s28 }
   0x7   :  { %127 = vmatpush.bf16.msra.mxu2 %v121_v1  ;;  %128 = vmatpush.bf16.msra.mxu3 %v121_v1  ;;  %s160_s5 = smov 8  }
   0x9   :  { %117 = vmatmul.msk.bf16.vlgmr.msra.gmra.mxu0 %vm41_vm0, %v21_v10  ;;  %118 = vmatmul.msk.bf16.vlgmr.msra.gmra.mxu1 %vm41_vm0, %v22_v11 }
   0xa   :  { %119 = vmatmul.msk.bf16.vlgmr.msra.gmra.mxu2 %vm41_vm0, %v23_v12  ;;  %120 = vmatmul.msk.bf16.vlgmr.msra.gmra.mxu3 %vm41_vm0, %v24_v13 }
  0x86   :  { %v63_v14 = vpop.f32.mrf.mxu0  ;;  %v68_v15 = vpop.f32.mrf.mxu1 }
  0x87   :  { %83 = vst.msk [vmem:[#allocation2] sm:$0xff] %vm41_vm0, %v63_v14 }
  0x88   :  { %85 = vst.msk [vmem:[#allocation2 + $0x10] sm:$0xff] %vm41_vm0, %v68_v15 }
  0x8d   :  { %v73_v16 = vpop.f32.mrf.mxu2  ;;  %v78_v17 = vpop.f32.mrf.mxu3 }
  0x8e   :  { %87 = vst.msk [vmem:[#allocation2 + $0x20] sm:$0xff] %vm41_vm0, %v73_v16  ;;  %v65_v18 = vpop.f32.mrf.mxu0  ;;  %v70_v19 = vpop.f32.mrf.mxu1 }
  0x8f   :  { %89 = vst.msk [vmem:[#allocation2 + $0x30] sm:$0xff] %vm41_vm0, %v78_v17 }
  0x90   :  { %84 = vst.msk [vmem:[#allocation2 + $0x8] sm:$0xff] %vm41_vm0, %v65_v18 }
  0x91   :  { %86 = vst.msk [vmem:[#allocation2 + $0x18] sm:$0xff] %vm41_vm0, %v70_v19 }
  0x95   :  { %v75_v20 = vpop.f32.mrf.mxu2  ;;  %v80_v21 = vpop.f32.mrf.mxu3 }
  0x96   :  { %88 = vst.msk [vmem:[#allocation2 + $0x28] sm:$0xff] %vm41_vm0, %v75_v20 }
  0x97   :  { %90 = vst.msk [vmem:[#allocation2 + $0x38] sm:$0xff] %vm41_vm0, %v80_v21 }
  0x98   :  { %103 = dma.vmem_to_hbm [thread:$0]  %s96_s28, 1024, %s98_s3, [#allocation3], %s159_s4, %s159_s4, %s160_s5  }
  0x99   :  { %156 = dma.done.wait [#allocation3], 1024  }
  0x9a   :  { %157 = vsyncadd [#allocation3], 4294966272 }
  0x9b   :  { %108 = vsyncpa [#allocation3], 1 }

</bundles_post_ra>
